<compile_context>
chip_gen: v6e
topology: v6e:2x2x1
jax: 0.10.0
libtpu: 0.0.40
codegen_flags: <defaults>
</compile_context>

<pallas_src>
import jax
import jax.numpy as jnp
from jax import lax
from jax.experimental import pallas as pl
from jax.experimental.pallas import tpu as pltpu


def _round_up(x: int, m: int) -> int:
    return ((x + m - 1) // m) * m


def _cdiv(a: int, b: int) -> int:
    return (a + b - 1) // b


def _linear_kernel_multi_k(x_ref, w_ref, b_ref, o_ref, acc_ref):
    # x_ref: (tm, tk), w_ref: (tn, tk) [PyTorch (N, K)], b_ref: (1, tn) f32,
    # o_ref: (tm, tn), acc_ref: (tm, tn) f32 scratch resident across K.
    k = pl.program_id(2)

    @pl.when(k == 0)
    def _init():
        acc_ref[...] = jnp.zeros_like(acc_ref)

    acc_ref[...] += lax.dot_general(
        x_ref[...],
        w_ref[...],
        dimension_numbers=(((1,), (1,)), ((), ())),   # contract K of x with K of W
        preferred_element_type=jnp.float32,
    )

    @pl.when(k == pl.num_programs(2) - 1)
    def _finalize():
        o_ref[...] = (acc_ref[...] + b_ref[...]).astype(o_ref.dtype)


def _linear_kernel_single_k(x_ref, w_ref, b_ref, o_ref):
    # Whole K in one block: no scratch, no init/finalize branches.
    acc = lax.dot_general(
        x_ref[...],
        w_ref[...],
        dimension_numbers=(((1,), (1,)), ((), ())),
        preferred_element_type=jnp.float32,
    )
    o_ref[...] = (acc + b_ref[...]).astype(o_ref.dtype)


def linear_forward(x, weight, bias, *, tm=512, tn=512, tk=2048,
                   compute_dtype=jnp.bfloat16):
    """Pallas implementation of nn.Linear forward.

    x:      (batch, input_dim)
    weight: (output_dim, input_dim)   (PyTorch layout)
    bias:   (output_dim,)
    returns (batch, output_dim) in x's dtype (accumulation is f32).
    """
    M, K = x.shape
    N, K2 = weight.shape
    assert K == K2 and bias.shape == (N,)
    out_dtype = jnp.dtype(x.dtype)

    cd = jnp.dtype(compute_dtype) if compute_dtype is not None else out_dtype
    # Sublane alignment of the second-to-last block dim depends on packing.
    m_align = 16 if cd.itemsize == 2 else 8

    # Clamp tiles to the problem size, keeping (sublane, lane) alignment.
    tm = _round_up(min(tm, M), m_align)
    tn = _round_up(min(tn, N), 128)
    tk = _round_up(min(tk, K), 128)
    Mp, Np, Kp = _round_up(M, tm), _round_up(N, tn), _round_up(K, tk)

    # v7x megacore: make sure there are >= 2 parallel blocks when possible.
    if (Mp // tm) * (Np // tn) < 2 and M > m_align:
        tm_split = _round_up(_cdiv(M, 2), m_align)
        if tm_split < tm:
            tm = tm_split
            Mp = _round_up(M, tm)

    # Pad only when a dim is actually unaligned (skip the HBM round trip otherwise).
    x_p, w_p, b_p = x, weight, bias
    if (Mp, Kp) != (M, K):
        x_p = jnp.pad(x_p, ((0, Mp - M), (0, Kp - K)))
    if (Np, Kp) != (N, K):
        w_p = jnp.pad(w_p, ((0, Np - N), (0, Kp - K)))
    if Np != N:
        b_p = jnp.pad(b_p, (0, Np - N))
    if x_p.dtype != cd:
        x_p = x_p.astype(cd)
        w_p = w_p.astype(cd)
    b2d = b_p.reshape(1, Np).astype(jnp.float32)   # bias added once, in f32

    gm, gn, gk = Mp // tm, Np // tn, Kp // tk

    if gk == 1:
        kernel = _linear_kernel_single_k
        grid = (gm, gn)
        in_specs = [
            pl.BlockSpec((tm, tk), lambda i, j: (i, 0)),    # x
            pl.BlockSpec((tn, tk), lambda i, j: (j, 0)),    # weight (N, K)
            pl.BlockSpec((1, tn), lambda i, j: (0, j)),     # bias
        ]
        out_specs = pl.BlockSpec((tm, tn), lambda i, j: (i, j))
        scratch_shapes = []
        dim_sem = ("parallel", "parallel")
        acc_bytes = 0
    else:
        kernel = _linear_kernel_multi_k
        grid = (gm, gn, gk)
        in_specs = [
            pl.BlockSpec((tm, tk), lambda i, j, k: (i, k)),  # x
            pl.BlockSpec((tn, tk), lambda i, j, k: (j, k)),  # weight (N, K)
            pl.BlockSpec((1, tn), lambda i, j, k: (0, j)),   # bias
        ]
        out_specs = pl.BlockSpec((tm, tn), lambda i, j, k: (i, j))
        scratch_shapes = [pltpu.VMEM((tm, tn), jnp.float32)]
        dim_sem = ("parallel", "parallel", "arbitrary")
        acc_bytes = tm * tn * 4

    # Conservative VMEM estimate (double-buffered ins/outs + scratch); only raise
    # the scoped limit if this tiling exceeds the lowest default (v5e ~16 MiB).
    vmem_est = (2 * tm * tk * cd.itemsize + 2 * tn * tk * cd.itemsize
                + 2 * tm * tn * out_dtype.itemsize + 2 * tn * 4 + acc_bytes)
    vmem_limit = None
    if vmem_est > 14 * 1024 * 1024:
        vmem_limit = min(2 * vmem_est, 60 * 1024 * 1024)

    cost = pl.CostEstimate(
        flops=2 * M * N * K,
        transcendentals=0,
        bytes_accessed=(M * K + N * K) * cd.itemsize
                       + N * 4 + M * N * out_dtype.itemsize,
    )

    out = pl.pallas_call(
        kernel,
        out_shape=jax.ShapeDtypeStruct((Mp, Np), out_dtype),
        grid_spec=pltpu.PrefetchScalarGridSpec(
            num_scalar_prefetch=0,
            grid=grid,
            in_specs=in_specs,
            out_specs=out_specs,
            scratch_shapes=scratch_shapes,
        ),
        compiler_params=pltpu.CompilerParams(
            dimension_semantics=dim_sem,
            vmem_limit_bytes=vmem_limit,
        ),
        cost_estimate=cost,
    )(x_p, w_p, b2d)

    if (Mp, Np) != (M, N):
        out = out[:M, :N]
    return out


if __name__ == "__main__":
    key = jax.random.PRNGKey(0)
    k_x, k_w, k_b, k_x2, k_w2, k_b2 = jax.random.split(key, 6)

    def bf16_round(a):
        return a.astype(jnp.bfloat16).astype(jnp.float32)

    # --- Test A: toy shapes matching the original module usage (padded, single-K) ---
    batch, input_dim, output_dim = 8, 32, 16
    bound = 1.0 / (input_dim ** 0.5)
    weight = jax.random.uniform(k_w, (output_dim, input_dim), jnp.float32, -bound, bound)
    bias = jax.random.uniform(k_b, (output_dim,), jnp.float32, -bound, bound)
    x = jax.random.normal(k_x, (batch, input_dim), jnp.float32)

    out = jax.block_until_ready(linear_forward(x, weight, bias))
    ref_bf16 = bf16_round(x) @ bf16_round(weight).T + bias   # same input rounding, f32 acc
    ref_f32 = x @ weight.T + bias
    assert out.shape == (batch, output_dim)
    assert jnp.allclose(out, ref_bf16, atol=1e-3, rtol=1e-3)
    assert jnp.allclose(out, ref_f32, atol=5e-2, rtol=5e-2)   # loose sanity vs pure f32

    # --- Test B: aligned multi-tile shape (no padding, megacore M split, single-K) ---
    M2, K2_, N2 = 512, 1024, 384
    w2 = jax.random.normal(k_w2, (N2, K2_), jnp.float32) * 0.02
    b2 = jax.random.normal(k_b2, (N2,), jnp.float32) * 0.02
    x2 = jax.random.normal(k_x2, (M2, K2_), jnp.float32)

    out2 = jax.block_until_ready(linear_forward(x2, w2, b2))
    ref2_bf16 = bf16_round(x2) @ bf16_round(w2).T + b2
    assert out2.shape == (M2, N2)
    assert jnp.allclose(out2, ref2_bf16, atol=2e-3, rtol=2e-3)

    # --- Test C: force the multi-K accumulator path in f32 compute ---
    out3 = jax.block_until_ready(
        linear_forward(x2, w2, b2, tk=256, compute_dtype=jnp.float32))
    ref3 = x2 @ w2.T + b2
    assert out3.shape == (M2, N2)
    assert jnp.allclose(out3, ref3, atol=2e-3, rtol=2e-3)

    print("KERNEL_OK")
</pallas_src>

<mosaic_0001>
module attributes {stable_mosaic.version = 11 : i64} {
  func.func @_linear_kernel_single_k(%arg0: i32, %arg1: i32, %arg2: memref<16x128xbf16, #tpu.memory_space<vmem>>, %arg3: memref<128x128xbf16, #tpu.memory_space<vmem>>, %arg4: memref<1x128xf32, #tpu.memory_space<vmem>>, %arg5: memref<16x128xf32, #tpu.memory_space<vmem>>) attributes {dimension_semantics = [#tpu.dimension_semantics<parallel>, #tpu.dimension_semantics<parallel>], iteration_bounds = array<i64: 1, 1>, scalar_prefetch = 0 : i64, scratch_operands = 0 : i64, tpu.core_type = #tpu.core_type<tc>, window_params = [{transform_indices = @transform_0, window_bounds = array<i64: 16, 128>}, {transform_indices = @transform_1, window_bounds = array<i64: 128, 128>}, {transform_indices = @transform_2, window_bounds = array<i64: 1, 128>}, {transform_indices = @transform_3, window_bounds = array<i64: 16, 128>}]} {
    %c0 = arith.constant 0 : index
    %c0_0 = arith.constant 0 : index
    %0 = vector.load %arg2[%c0, %c0_0] : memref<16x128xbf16, #tpu.memory_space<vmem>>, vector<16x128xbf16>
    %c0_1 = arith.constant 0 : index
    %c0_2 = arith.constant 0 : index
    %1 = vector.load %arg3[%c0_1, %c0_2] : memref<128x128xbf16, #tpu.memory_space<vmem>>, vector<128x128xbf16>
    %cst = arith.constant dense<0.000000e+00> : vector<16x128xf32>
    %2 = tpu.matmul %0, %1, %cst {dimension_numbers = #tpu.dot_dimension_numbers<[1], [1], [0], [0], [0, 0, 1, 0], [], []>} : vector<16x128xbf16>, vector<128x128xbf16>, vector<16x128xf32> -> vector<16x128xf32>
    %c0_3 = arith.constant 0 : index
    %c0_4 = arith.constant 0 : index
    %3 = vector.load %arg4[%c0_3, %c0_4] : memref<1x128xf32, #tpu.memory_space<vmem>>, vector<1x128xf32>
    %4 = vector.broadcast %3 : vector<1x128xf32> to vector<16x128xf32>
    %5 = arith.addf %2, %4 : vector<16x128xf32>
    %c0_5 = arith.constant 0 : index
    %c0_6 = arith.constant 0 : index
    %6 = vector.load %arg5[%c0_5, %c0_6] : memref<16x128xf32, #tpu.memory_space<vmem>>, vector<16x128xf32>
    tpu.vector_store %arg5[%c0_5, %c0_6], %5 {strides = array<i32>} : memref<16x128xf32, #tpu.memory_space<vmem>>, vector<16x128xf32>,
    return
  }
  func.func @transform_0(%arg0: i32, %arg1: i32) -> (i32, i32) {
    %c0_i32 = arith.constant 0 : i32
    %c0_i32_0 = arith.constant 0 : i32
    return %arg0, %c0_i32 : i32, i32
  }
  func.func @transform_1(%arg0: i32, %arg1: i32) -> (i32, i32) {
    %c0_i32 = arith.constant 0 : i32
    %c0_i32_0 = arith.constant 0 : i32
    return %arg1, %c0_i32 : i32, i32
  }
  func.func @transform_2(%arg0: i32, %arg1: i32) -> (i32, i32) {
    %c0_i32 = arith.constant 0 : i32
    %c0_i32_0 = arith.constant 0 : i32
    return %c0_i32, %arg1 : i32, i32
  }
  func.func @transform_3(%arg0: i32, %arg1: i32) -> (i32, i32) {
    %c0_i32 = arith.constant 0 : i32
    return %arg0, %arg1 : i32, i32
  }
}

</mosaic_0001>

<bundles_post_ra>
// kernel: tpu_custom_call.1
= control target key start
LH: loop header
LB: loop body
LE: loop exit
PB: predicated region body
PF: predicated region fallthrough
CT: control target
= control target key end

     0   :  { %8 = vsyncpa [#allocation3], 0  ;;  %s348_s0 = inlined_call_operand.hbm [shape: bf16[16,128], index: 0, kind: input, shape index: {}]   ;;  %s349_s1 = inlined_call_operand.hbm [shape: bf16[128,128], index: 1, kind: input, shape index: {}]   ;;  %s350_s2 = inlined_call_operand.vmem [shape: f32[1,128], index: 2, kind: input, shape index: {}]   ;;  %s351_s3 = inlined_call_operand.hbm [shape: f32[16,128], index: 3, kind: output, shape index: {}]  }
   0x1   :  { %9 = vsyncpa [#allocation6], 0 }
   0x2   :  { %10 = vsyncpa [#allocation4], 0  ;;  %s307_s12 = smov [#allocation2]  }
   0x3   :  { %s16_s13 = sshll.u32 %s307_s12, 4  ;;  %s17_s13 = int_to_ptr.vmem [resolvable:$true] %s16_s13 }
   0x4   :  { %s249_s14 = scalar_lea.vmem %s17_s13, 128  ;;  %p254_p1 = scmp.lt.s32.totalorder %s17_s13, %s17_s13 }
   0x5   :  { %p250_p0 = scmp.ne.s32.totalorder %s17_s13, %s249_s14  ;;  %p255_p2 = scmp.lt.s32.totalorder %s249_s14, %s249_s14 }
   0x7   :  { %p256_p3 = por %p255_p2, %p254_p1 }
   0x9   :  { %p257_p4 = pnand %p256_p3, %p250_p0 }
   0xb   :  { %260 = shalt.err (!%p257_p4)
}
   0xc   :  { %s308_s15 = smov 64   ;;  %s309_s16 = smov 4  }
   0xd   :  { %22 = dma.hbm_to_vmem [thread:$0]  %s348_s0, 128, %s17_s13, [#allocation3], %s308_s15, %s308_s15, %s309_s16  }
   0xe   :  { %s310_s19 = smov [#allocation5]  }
   0xf   :  { %s28_s20 = sshll.u32 %s310_s19, 4  ;;  %s29_s20 = int_to_ptr.vmem [resolvable:$true] %s28_s20 }
  0x10   :  { %s269_s21 = scalar_lea.vmem %s29_s20, 1024  ;;  %p274_p6 = scmp.lt.s32.totalorder %s29_s20, %s29_s20 }
  0x11   :  { %p270_p5 = scmp.ne.s32.totalorder %s29_s20, %s269_s21  ;;  %p275_p7 = scmp.lt.s32.totalorder %s269_s21, %s269_s21 }
  0x13   :  { %p276_p8 = por %p275_p7, %p274_p6 }
  0x15   :  { %p277_p9 = pnand %p276_p8, %p270_p5 }
  0x17   :  { %280 = shalt.err (!%p277_p9)
}
  0x18   :  { %34 = dma.hbm_to_vmem [thread:$0]  %s349_s1, 1024, %s29_s20, [#allocation6], %s308_s15, %s308_s15, %s309_s16  }
  0x19   :  { %301 = dma.done.wait [#allocation3], 128  }
  0x1a   :  { %302 = vsyncadd [#allocation3], 4294967168 }
  0x1b   :  { %303 = dma.done.wait [#allocation6], 1024  }
  0x1c   :  { %304 = vsyncadd [#allocation6], 4294966272  ;;  %v311_v0 = vmov 0.0   ;;  %vm312_vm0 = vmmov 0   ;;  %v232_v1 = vld [vmem:[#allocation5 + $0x38] sm:$0xff]   ;;  %v233_v2 = vld [vmem:[#allocation5 + $0x30] sm:$0xff]  }
  0x1d   :  { %203 = vmatprep.subr.bf16.mxu0 %v311_v0  ;;  %219 = vmatprep.mubr.msk.bf16.mxu0 %vm312_vm0, %v311_v0  ;;  %v234_v3 = vld [vmem:[#allocation5 + $0x28] sm:$0xff]   ;;  %v235_v4 = vld [vmem:[#allocation5 + $0x20] sm:$0xff]   ;;  %v236_v5 = vld [vmem:[#allocation5 + $0x18] sm:$0xff]   ;;  %s313_s24 = smov [#allocation7]  }
  0x1e   :  { %204 = vmatpush3.bf16.xpose.msra.mxu0 %v232_v1  ;;  %v237_v6 = vld [vmem:[#allocation5 + $0x10] sm:$0xff]   ;;  %v238_v7 = vld [vmem:[#allocation5 + $0x8] sm:$0xff]   ;;  %v239_v8 = vld [vmem:[#allocation5] sm:$0xff]   ;;  %s171_s25 = sshll.u32 %s313_s24, 4  ;;  %s172_s25 = int_to_ptr.vmem [resolvable:$true] %s171_s25 }
  0x1f   :  { %205 = vmatprep.subr.bf16.mxu0 %v311_v0  ;;  %v240_v9 = vld [vmem:[#allocation2] sm:$0xff]   ;;  %s281_s26 = scalar_lea.vmem %s172_s25, 256  ;;  %p286_p11 = scmp.lt.s32.totalorder %s172_s25, %s172_s25 }
  0x20   :  { %v184_v10 = vld [vmem:[%s350_s2] ss:$0 sm:$0xff]  ;;  %p282_p10 = scmp.ne.s32.totalorder %s172_s25, %s281_s26  ;;  %p287_p12 = scmp.lt.s32.totalorder %s281_s26, %s281_s26 }
  0x22   :  { %p288_p13 = por %p287_p12, %p286_p11 }
  0x24   :  { %p289_p0 = pnand %p288_p13, %p282_p10 }
  0x26   :  { %206 = vmatpush3.bf16.xpose.msra.mxu0 %v233_v2 }
  0x27   :  { %207 = vmatprep.subr.bf16.mxu0 %v311_v0 }
  0x2e   :  { %208 = vmatpush3.bf16.xpose.msra.mxu0 %v234_v3 }
  0x2f   :  { %209 = vmatprep.subr.bf16.mxu0 %v311_v0 }
  0x36   :  { %210 = vmatpush3.bf16.xpose.msra.mxu0 %v235_v4 }
  0x37   :  { %211 = vmatprep.subr.bf16.mxu0 %v311_v0 }
  0x3e   :  { %212 = vmatpush3.bf16.xpose.msra.mxu0 %v236_v5 }
  0x3f   :  { %213 = vmatprep.subr.bf16.mxu0 %v311_v0 }
  0x46   :  { %214 = vmatpush3.bf16.xpose.msra.mxu0 %v237_v6 }
  0x47   :  { %215 = vmatprep.subr.bf16.mxu0 %v311_v0 }
  0x4e   :  { %216 = vmatpush3.bf16.xpose.msra.mxu0 %v238_v7 }
  0x4f   :  { %217 = vmatprep.subr.bf16.mxu0 %v311_v0 }
  0x56   :  { %218 = vmatpush3.bf16.xpose.msra.mxu0 %v239_v8 }
  0x5d   :  { %220 = vmatmul.mubr.bf16.vlgmr.msra.gmra.mxu0 %v240_v9 }
 0x11d   :  { %v157_v11 = vpop.f32.mrf.mxu0 }
 0x11e   :  { %v158_v12 = vadd.f32 %v184_v10, %v157_v11 }
 0x11f   :  { %v221_v13 = vpop.f32.mrf.mxu0 }
 0x120   :  { %164 = vst [vmem:[#allocation7] sm:$0xff] %v158_v12 }
 0x121   :  { %v160_v14 = vpop.f32.mrf.mxu0 }
 0x122   :  { %v161_v15 = vadd.f32 %v184_v10, %v160_v14 }
 0x123   :  { %v222_v16 = vpop.f32.mrf.mxu0 }
 0x124   :  { %165 = vst [vmem:[#allocation7 + $0x8] sm:$0xff] %v161_v15 }
 0x125   :  { %292 = shalt.err (!%p289_p0)
}
 0x126   :  { %s314_s27 = smov 128   ;;  %s315_s2 = smov 8  }
 0x127   :  { %177 = dma.vmem_to_hbm [thread:$0]  %s172_s25, 256, %s351_s3, [#allocation4], %s314_s27, %s314_s27, %s315_s2  }
 0x128   :  { %305 = dma.done.wait [#allocation4], 256  }
 0x129   :  { %306 = vsyncadd [#allocation4], 4294967040 }
 0x12a   :  { %181 = vsyncpa [#allocation3], 1 }
 0x12b   :  { %182 = vsyncpa [#allocation6], 1 }
 0x12c   :  { %183 = vsyncpa [#allocation4], 1 }

</bundles_post_ra>
